<compile_context>
chip_gen: v6e
topology: v6e:2x2x1
jax: 0.10.0
libtpu: 0.0.40
codegen_flags: <defaults>
</compile_context>

<pallas_src>
import functools

import jax
import jax.numpy as jnp
from jax.experimental import pallas as pl
from jax.experimental.pallas import tpu as pltpu


def _round_up(x, m):
    return ((x + m - 1) // m) * m


def _critic_mlp_kernel(s_ref, a_ref, w1s_ref, w1a_ref, b1_ref,
                       w2_ref, b2_ref, w3_ref, b3_ref, q_ref, *, matmul_dtype):
    """One batch tile, batch on lanes: intermediates are (H, TB), output (1, TB)."""
    sT = jnp.transpose(s_ref[...])          # (D, TB)
    aT = jnp.transpose(a_ref[...])          # (A, TB)

    # Layer 1: W1s (H1, D) @ sT (D, TB) on the MXU; the action term (K = A = 2)
    # is done as VPU broadcast multiply-adds -- an MXU push for K=2 is pure
    # overhead and the VPU has slack here. Equivalent to cat([s, a]) @ W1.T.
    h1 = jnp.dot(w1s_ref[...].astype(matmul_dtype), sT.astype(matmul_dtype),
                 preferred_element_type=jnp.float32)            # (H1, TB)
    for k in range(aT.shape[0]):            # static unroll over n_actions
        h1 = h1 + w1a_ref[:, k:k + 1] * aT[k:k + 1, :]
    h1 = jnp.maximum(h1 + b1_ref[...], 0.0)                     # ReLU, (H1, TB)

    # Layer 2: (H2, H1) @ (H1, TB)
    h2 = jnp.dot(w2_ref[...].astype(matmul_dtype), h1.astype(matmul_dtype),
                 preferred_element_type=jnp.float32) + b2_ref[...]
    h2 = jnp.maximum(h2, 0.0)                                   # (H2, TB)

    # Head: (1, H2) @ (H2, TB) -> lane-dense (1, TB)
    q = jnp.dot(w3_ref[...].astype(matmul_dtype), h2.astype(matmul_dtype),
                preferred_element_type=jnp.float32) + b3_ref[...]
    q_ref[...] = q.astype(q_ref.dtype)


@functools.partial(jax.jit, static_argnames=("block_batch", "matmul_dtype"))
def critic_forward(state, action, params, block_batch=4096,
                   matmul_dtype=jnp.float32):
    """Pallas forward of CriticNetwork.forward; returns q of shape (B,)."""
    w1s, w1a, b1, w2, b2, w3, b3 = params
    batch, d = state.shape
    a_dim = action.shape[1]
    h1_dim = w1s.shape[0]
    h2_dim = w2.shape[0]

    assert block_batch > 0 and block_batch % 128 == 0, \
        "batch tile must be a multiple of 128 (lane-dense output blocks)"

    # Tile choice:
    #  * B <= 256: one full-array tile (block == array is always layout-legal).
    #  * B  > 256: tile is a multiple of 128 and at most ceil(B/2), so the
    #    "parallel" batch axis has >= 2 steps (both v7x TensorCores used).
    #    Ragged last block is clipped by Pallas -- no jnp.pad HBM round trip.
    if batch <= 256:
        tb = batch
    else:
        tb = min(block_batch, _round_up(pl.cdiv(batch, 2), 128))
    grid = (pl.cdiv(batch, tb),)

    def batch_block(cols):
        return pl.BlockSpec((tb, cols), lambda i: (i, 0))

    def resident(arr):
        # Constant block index: weights/biases stay VMEM-resident across steps.
        return pl.BlockSpec(arr.shape, lambda i: (0, 0))

    weight_bytes = sum(int(p.size) * 4 for p in (w1s, w1a, b1, w2, b2, w3, b3))
    cost = pl.CostEstimate(
        flops=2 * batch * (d * h1_dim + a_dim * h1_dim + h1_dim * h2_dim + h2_dim),
        transcendentals=0,
        bytes_accessed=4 * batch * (d + a_dim + 1) + weight_bytes,
    )

    q2d = pl.pallas_call(
        functools.partial(_critic_mlp_kernel, matmul_dtype=matmul_dtype),
        out_shape=jax.ShapeDtypeStruct((1, batch), jnp.float32),
        grid=grid,
        in_specs=[
            batch_block(d),          # state  (B, D) -> (TB, D)
            batch_block(a_dim),      # action (B, A) -> (TB, A)
            resident(w1s), resident(w1a), resident(b1),
            resident(w2), resident(b2),
            resident(w3), resident(b3),
        ],
        out_specs=pl.BlockSpec((1, tb), lambda i: (0, i)),   # lane-dense output
        compiler_params=pltpu.CompilerParams(
            dimension_semantics=("parallel",)),              # v7x: 2 TCs
        cost_estimate=cost,
    )(state, action, w1s, w1a, b1, w2, b2, w3, b3)

    # (1, B) -> (B,): contiguous reshape, fused under this jit.
    return q2d[0]


def init_linear(key, fan_in, fan_out):
    """torch.nn.Linear default init; torch layout W:(out, in), b:(out, 1)."""
    kw, kb = jax.random.split(key)
    bound = 1.0 / float(fan_in) ** 0.5
    w = jax.random.uniform(kw, (fan_out, fan_in), jnp.float32, -bound, bound)
    b = jax.random.uniform(kb, (fan_out, 1), jnp.float32, -bound, bound)
    return w, b


def make_params(key, input_dims, n_actions, hidden_sizes):
    """Params in torch layout with W1 pre-split into state/action column blocks."""
    assert len(hidden_sizes) == 2, "kernel is specialized to two hidden layers"
    sizes = [input_dims + n_actions] + list(hidden_sizes) + [1]
    keys = jax.random.split(key, len(sizes) - 1)
    (w1, b1), (w2, b2), (w3, b3) = [
        init_linear(k, fin, fout)
        for k, fin, fout in zip(keys, sizes[:-1], sizes[1:])
    ]
    w1s, w1a = w1[:, :input_dims], w1[:, input_dims:]
    return (w1s, w1a, b1, w2, b2, w3, b3)


def reference_forward(state, action, params):
    """Plain-JAX reference (full-precision matmuls) for correctness checks."""
    w1s, w1a, b1, w2, b2, w3, b3 = params
    hp = jax.lax.Precision.HIGHEST
    x = jnp.concatenate([state, action], axis=-1)
    w1 = jnp.concatenate([w1s, w1a], axis=1)
    h = jnp.maximum(jnp.dot(x, w1.T, precision=hp) + b1[:, 0], 0.0)
    h = jnp.maximum(jnp.dot(h, w2.T, precision=hp) + b2[:, 0], 0.0)
    return jnp.squeeze(jnp.dot(h, w3.T, precision=hp) + b3[:, 0], -1)


if __name__ == "__main__":
    key = jax.random.PRNGKey(0)
    k_param, k_state, k_action = jax.random.split(key, 3)

    input_dims = 8        # 2-DOF observation size (small synthetic choice)
    n_actions = 2
    hidden_sizes = (32, 32)
    params = make_params(k_param, input_dims, n_actions, hidden_sizes)

    # Case 1: tiny batch, single full-array tile (grid = 1).
    batch = 4
    state = jax.random.normal(k_state, (batch, input_dims), jnp.float32)
    action = jax.random.normal(k_action, (batch, n_actions), jnp.float32)
    q = jax.block_until_ready(critic_forward(state, action, params))
    q_ref = reference_forward(state, action, params)
    assert q.shape == (batch,)
    assert jnp.allclose(q, q_ref, atol=1e-4, rtol=1e-3), (q, q_ref)

    # Case 2: multi-step batch grid with an unpadded ragged last tile
    # (B=300 -> TB=256, grid=2, partial last block clipped by Pallas).
    batch2 = 300
    state2 = jax.random.normal(k_state, (batch2, input_dims), jnp.float32)
    action2 = jax.random.normal(k_action, (batch2, n_actions), jnp.float32)
    q2 = jax.block_until_ready(critic_forward(state2, action2, params))
    q2_ref = reference_forward(state2, action2, params)
    assert q2.shape == (batch2,)
    assert jnp.allclose(q2, q2_ref, atol=1e-4, rtol=1e-3), \
        float(jnp.max(jnp.abs(q2 - q2_ref)))

    # Case 3: bf16 matmul operands (v5e bf16-native MXU path), f32 accumulation.
    q3 = jax.block_until_ready(
        critic_forward(state2, action2, params, matmul_dtype=jnp.bfloat16))
    assert q3.shape == (batch2,)
    assert jnp.allclose(q3, q2_ref, atol=3e-2, rtol=3e-2), \
        float(jnp.max(jnp.abs(q3 - q2_ref)))

    print("KERNEL_OK")
</pallas_src>

<mosaic_0001>
module attributes {stable_mosaic.version = 11 : i64} {
  func.func @_critic_mlp_kernel(%arg0: i32, %arg1: memref<4x8xf32, #tpu.memory_space<vmem>>, %arg2: memref<4x2xf32, #tpu.memory_space<vmem>>, %arg3: memref<32x8xf32, #tpu.memory_space<vmem>>, %arg4: memref<32x2xf32, #tpu.memory_space<vmem>>, %arg5: memref<32x1xf32, #tpu.memory_space<vmem>>, %arg6: memref<32x32xf32, #tpu.memory_space<vmem>>, %arg7: memref<32x1xf32, #tpu.memory_space<vmem>>, %arg8: memref<1x32xf32, #tpu.memory_space<vmem>>, %arg9: memref<1x1xf32, #tpu.memory_space<vmem>>, %arg10: memref<1x4xf32, #tpu.memory_space<vmem>>) attributes {dimension_semantics = [#tpu.dimension_semantics<parallel>], iteration_bounds = array<i64: 1>, scalar_prefetch = 0 : i64, scratch_operands = 0 : i64, tpu.core_type = #tpu.core_type<tc>, window_params = [{transform_indices = @transform_0, window_bounds = array<i64: 4, 8>}, {transform_indices = @transform_1, window_bounds = array<i64: 4, 2>}, {pipeline_mode = #tpu.pipeline_mode<synchronous>, transform_indices = @transform_2, window_bounds = array<i64: 32, 8>}, {pipeline_mode = #tpu.pipeline_mode<synchronous>, transform_indices = @transform_3, window_bounds = array<i64: 32, 2>}, {pipeline_mode = #tpu.pipeline_mode<synchronous>, transform_indices = @transform_4, window_bounds = array<i64: 32, 1>}, {pipeline_mode = #tpu.pipeline_mode<synchronous>, transform_indices = @transform_5, window_bounds = array<i64: 32, 32>}, {pipeline_mode = #tpu.pipeline_mode<synchronous>, transform_indices = @transform_6, window_bounds = array<i64: 32, 1>}, {pipeline_mode = #tpu.pipeline_mode<synchronous>, transform_indices = @transform_7, window_bounds = array<i64: 1, 32>}, {pipeline_mode = #tpu.pipeline_mode<synchronous>, transform_indices = @transform_8, window_bounds = array<i64: 1, 1>}, {transform_indices = @transform_9, window_bounds = array<i64: 1, 4>}]} {
    %c0 = arith.constant 0 : index
    %c0_0 = arith.constant 0 : index
    %0 = vector.load %arg1[%c0, %c0_0] : memref<4x8xf32, #tpu.memory_space<vmem>>, vector<4x8xf32>
    %1 = tpu.transpose %0, [1, 0] : vector<4x8xf32> -> vector<8x4xf32>
    %c0_1 = arith.constant 0 : index
    %c0_2 = arith.constant 0 : index
    %2 = vector.load %arg2[%c0_1, %c0_2] : memref<4x2xf32, #tpu.memory_space<vmem>>, vector<4x2xf32>
    %3 = tpu.transpose %2, [1, 0] : vector<4x2xf32> -> vector<2x4xf32>
    %c0_3 = arith.constant 0 : index
    %c0_4 = arith.constant 0 : index
    %4 = vector.load %arg3[%c0_3, %c0_4] : memref<32x8xf32, #tpu.memory_space<vmem>>, vector<32x8xf32>
    %cst = arith.constant dense<0.000000e+00> : vector<32x4xf32>
    %5 = tpu.matmul %4, %1, %cst {dimension_numbers = #tpu.dot_dimension_numbers<[1], [0], [0], [1], [0, 0, 1, 1], [], []>} : vector<32x8xf32>, vector<8x4xf32>, vector<32x4xf32> -> vector<32x4xf32>
    %c0_5 = arith.constant 0 : index
    %c0_6 = arith.constant 0 : index
    %6 = vector.load %arg4[%c0_5, %c0_6] : memref<32x2xf32, #tpu.memory_space<vmem>>, vector<32x1xf32>
    %7 = vector.extract_strided_slice %3 {offsets = [0, 0], sizes = [1, 4], strides = [1, 1]} : vector<2x4xf32> to vector<1x4xf32>
    %8 = vector.broadcast %6 : vector<32x1xf32> to vector<32x4xf32>
    %9 = vector.broadcast %7 : vector<1x4xf32> to vector<32x4xf32>
    %10 = arith.mulf %8, %9 : vector<32x4xf32>
    %11 = arith.addf %5, %10 : vector<32x4xf32>
    %c0_7 = arith.constant 0 : index
    %c1 = arith.constant 1 : index
    %12 = vector.load %arg4[%c0_7, %c1] : memref<32x2xf32, #tpu.memory_space<vmem>>, vector<32x1xf32>
    %13 = vector.extract_strided_slice %3 {offsets = [1, 0], sizes = [1, 4], strides = [1, 1]} : vector<2x4xf32> to vector<1x4xf32>
    %14 = vector.broadcast %12 : vector<32x1xf32> to vector<32x4xf32>
    %15 = vector.broadcast %13 : vector<1x4xf32> to vector<32x4xf32>
    %16 = arith.mulf %14, %15 : vector<32x4xf32>
    %17 = arith.addf %11, %16 : vector<32x4xf32>
    %c0_8 = arith.constant 0 : index
    %c0_9 = arith.constant 0 : index
    %18 = vector.load %arg5[%c0_8, %c0_9] : memref<32x1xf32, #tpu.memory_space<vmem>>, vector<32x1xf32>
    %19 = vector.broadcast %18 : vector<32x1xf32> to vector<32x4xf32>
    %20 = arith.addf %17, %19 : vector<32x4xf32>
    %cst_10 = arith.constant 0.000000e+00 : f32
    %21 = vector.broadcast %cst_10 : f32 to vector<32x4xf32>
    %22 = arith.maximumf %20, %21 : vector<32x4xf32>
    %c0_11 = arith.constant 0 : index
    %c0_12 = arith.constant 0 : index
    %23 = vector.load %arg6[%c0_11, %c0_12] : memref<32x32xf32, #tpu.memory_space<vmem>>, vector<32x32xf32>
    %cst_13 = arith.constant dense<0.000000e+00> : vector<32x4xf32>
    %24 = tpu.matmul %23, %22, %cst_13 {dimension_numbers = #tpu.dot_dimension_numbers<[1], [0], [0], [1], [0, 0, 1, 1], [], []>} : vector<32x32xf32>, vector<32x4xf32>, vector<32x4xf32> -> vector<32x4xf32>
    %c0_14 = arith.constant 0 : index
    %c0_15 = arith.constant 0 : index
    %25 = vector.load %arg7[%c0_14, %c0_15] : memref<32x1xf32, #tpu.memory_space<vmem>>, vector<32x1xf32>
    %26 = vector.broadcast %25 : vector<32x1xf32> to vector<32x4xf32>
    %27 = arith.addf %24, %26 : vector<32x4xf32>
    %cst_16 = arith.constant 0.000000e+00 : f32
    %28 = vector.broadcast %cst_16 : f32 to vector<32x4xf32>
    %29 = arith.maximumf %27, %28 : vector<32x4xf32>
    %c0_17 = arith.constant 0 : index
    %c0_18 = arith.constant 0 : index
    %30 = vector.load %arg8[%c0_17, %c0_18] : memref<1x32xf32, #tpu.memory_space<vmem>>, vector<1x32xf32>
    %cst_19 = arith.constant dense<0.000000e+00> : vector<1x4xf32>
    %31 = tpu.matmul %30, %29, %cst_19 {dimension_numbers = #tpu.dot_dimension_numbers<[1], [0], [0], [1], [0, 0, 1, 1], [], []>} : vector<1x32xf32>, vector<32x4xf32>, vector<1x4xf32> -> vector<1x4xf32>
    %c0_20 = arith.constant 0 : index
    %c0_21 = arith.constant 0 : index
    %32 = vector.load %arg9[%c0_20, %c0_21] : memref<1x1xf32, #tpu.memory_space<vmem>>, vector<1x1xf32>
    %33 = vector.broadcast %32 : vector<1x1xf32> to vector<1x4xf32>
    %34 = arith.addf %31, %33 : vector<1x4xf32>
    %c0_22 = arith.constant 0 : index
    %c0_23 = arith.constant 0 : index
    %35 = vector.load %arg10[%c0_22, %c0_23] : memref<1x4xf32, #tpu.memory_space<vmem>>, vector<1x4xf32>
    tpu.vector_store %arg10[%c0_22, %c0_23], %34 {strides = array<i32>} : memref<1x4xf32, #tpu.memory_space<vmem>>, vector<1x4xf32>,
    return
  }
  func.func @transform_0(%arg0: i32) -> (i32, i32) {
    %c0_i32 = arith.constant 0 : i32
    %c0_i32_0 = arith.constant 0 : i32
    return %arg0, %c0_i32 : i32, i32
  }
  func.func @transform_1(%arg0: i32) -> (i32, i32) {
    %c0_i32 = arith.constant 0 : i32
    %c0_i32_0 = arith.constant 0 : i32
    return %arg0, %c0_i32 : i32, i32
  }
  func.func @transform_2(%arg0: i32) -> (i32, i32) {
    %c0_i32 = arith.constant 0 : i32
    %c0_i32_0 = arith.constant 0 : i32
    %c0_i32_1 = arith.constant 0 : i32
    return %c0_i32, %c0_i32_0 : i32, i32
  }
  func.func @transform_3(%arg0: i32) -> (i32, i32) {
    %c0_i32 = arith.constant 0 : i32
    %c0_i32_0 = arith.constant 0 : i32
    %c0_i32_1 = arith.constant 0 : i32
    return %c0_i32, %c0_i32_0 : i32, i32
  }
  func.func @transform_4(%arg0: i32) -> (i32, i32) {
    %c0_i32 = arith.constant 0 : i32
    %c0_i32_0 = arith.constant 0 : i32
    %c0_i32_1 = arith.constant 0 : i32
    return %c0_i32, %c0_i32_0 : i32, i32
  }
  func.func @transform_5(%arg0: i32) -> (i32, i32) {
    %c0_i32 = arith.constant 0 : i32
    %c0_i32_0 = arith.constant 0 : i32
    %c0_i32_1 = arith.constant 0 : i32
    return %c0_i32, %c0_i32_0 : i32, i32
  }
  func.func @transform_6(%arg0: i32) -> (i32, i32) {
    %c0_i32 = arith.constant 0 : i32
    %c0_i32_0 = arith.constant 0 : i32
    %c0_i32_1 = arith.constant 0 : i32
    return %c0_i32, %c0_i32_0 : i32, i32
  }
  func.func @transform_7(%arg0: i32) -> (i32, i32) {
    %c0_i32 = arith.constant 0 : i32
    %c0_i32_0 = arith.constant 0 : i32
    %c0_i32_1 = arith.constant 0 : i32
    return %c0_i32, %c0_i32_0 : i32, i32
  }
  func.func @transform_8(%arg0: i32) -> (i32, i32) {
    %c0_i32 = arith.constant 0 : i32
    %c0_i32_0 = arith.constant 0 : i32
    %c0_i32_1 = arith.constant 0 : i32
    return %c0_i32, %c0_i32_0 : i32, i32
  }
  func.func @transform_9(%arg0: i32) -> (i32, i32) {
    %c0_i32 = arith.constant 0 : i32
    %c0_i32_0 = arith.constant 0 : i32
    return %c0_i32, %arg0 : i32, i32
  }
}

</mosaic_0001>

<bundles_post_ra>
// kernel: critic_forward.1
= control target key start
LH: loop header
LB: loop body
LE: loop exit
PB: predicated region body
PF: predicated region fallthrough
CT: control target
= control target key end

     0   :  { %s739_s0 = inlined_call_operand.vmem [shape: f32[4,8], index: 0, kind: input, shape index: {}]   ;;  %s740_s1 = inlined_call_operand.vmem [shape: f32[4,2], index: 1, kind: input, shape index: {}]   ;;  %s741_s2 = inlined_call_operand.vmem [shape: f32[32,8], index: 2, kind: input, shape index: {}]   ;;  %s742_s3 = inlined_call_operand.vmem [shape: f32[32,2], index: 3, kind: input, shape index: {}]   ;;  %s743_s4 = inlined_call_operand.vmem [shape: f32[32,1], index: 4, kind: input, shape index: {}]   ;;  %s744_s5 = inlined_call_operand.vmem [shape: f32[32,32], index: 5, kind: input, shape index: {}]   ;;  %s745_s6 = inlined_call_operand.vmem [shape: f32[32,1], index: 6, kind: input, shape index: {}]   ;;  %s746_s7 = inlined_call_operand.vmem [shape: f32[1,32], index: 7, kind: input, shape index: {}]   ;;  %s747_s8 = inlined_call_operand.<no memory space> [shape: f32[1,1], index: 8, kind: input, shape index: {}]   ;;  %s748_s9 = inlined_call_operand.hbm [shape: f32[1,4], index: 9, kind: output, shape index: {}]  }
   0x1   :  { %v14_v0 = vstv %s747_s8 }
   0x2   :  { %15 = vst [vmem:[#allocation2] sm:$0x1] %v14_v0 }
   0x3   :  { %v35_v1 = vld [vmem:[%s739_s0] sm:$0xf]  ;;  %vm105_vm0 = vcmask 64512   ;;  %v75_v2 = vld [vmem:[%s742_s3 + $0x10] sm:$0xff]  ;;  %v590_v4 = vmov 1   ;;  %v70_v5 = vld [vmem:[%s741_s2 + $0x8] sm:$0xff] }
   0x4   :  { %v69_v3 = vld [vmem:[%s741_s2] sm:$0xff]  ;;  %564 = vset.pattern.permute.xlu0 %v590_v4  ;;  %524 = vmatprep.subr.msk.mxu0 %vm105_vm0, %v35_v1  ;;  %v76_v6 = vld [vmem:[%s742_s3 + $0x18] sm:$0xff]  ;;  %v71_v7 = vld [vmem:[%s741_s2 + $0x10] sm:$0xff]  ;;  %v591_v8 = vmov 0  }
   0x5   :  { %215 = vperm.xlu0 %564, %v75_v2   ;;  %525 = vmatpush3.xpose.msk.msra.mxu0 %vm105_vm0, %v35_v1  ;;  %v72_v9 = vld [vmem:[%s741_s2 + $0x18] sm:$0xff]  ;;  %v74_v10 = vld [vmem:[%s742_s3 + $0x8] sm:$0xff] }
   0x6   :  { %526 = vmatprep.mubr.msk.f32.mxu0 %vm105_vm0, %v69_v3  ;;  %562 = vset.pattern.permute.xlu1 %v590_v4 }
   0x7   :  { %219 = vperm.xlu1 %562, %v76_v6  }
   0x8   :  { %527 = vmatmul.mubr.msk.f32.vlgmr.msra.gmra.mxu0 %vm105_vm0, %v70_v5 }
   0x9   :  { %565 = vset.pattern.permute.xlu0 %v591_v8  ;;  %529 = vmatprep.mubr.msk.f32.mxu0 %vm105_vm0, %v71_v7 }
   0xa   :  { %16 = vsyncpa [#allocation4], 0  ;;  %94 = vperm.xlu0 %565, %v76_v6   ;;  %v73_v11 = vld [vmem:[%s742_s3] sm:$0xff]  ;;  %v237_v12 = vld [vmem:[%s743_s4 + $0x18] sm:$0xff]  ;;  %vm294_vm1 = vcmask 261120   ;;  %v97_v29 = vlaneseq  ;;  %vm593_vm2 = vmmov 0  }
   0xb   :  { %563 = vset.pattern.permute.xlu1 %v591_v8  ;;  %v235_v13 = vld [vmem:[%s743_s4 + $0x8] sm:$0xff]  ;;  %v236_v14 = vld [vmem:[%s743_s4 + $0x10] sm:$0xff]  ;;  %v234_v15 = vld [vmem:[%s743_s4] sm:$0xff]  ;;  %s594_s26 = smov [#allocation3]   ;;  %vm480_vm3 = vcmask 24576  }
   0xc   :  { %530 = vmatmul.mubr.msk.f32.gmra.mxu0 %vm105_vm0, %v72_v9  ;;  %84 = vperm.xlu1 %563, %v74_v10   ;;  %v273_v16 = vld [vmem:[%s745_s6 + $0x18] sm:$0xff]  ;;  %v272_v17 = vld [vmem:[%s745_s6 + $0x10] sm:$0xff]  ;;  %v271_v18 = vld [vmem:[%s745_s6 + $0x8] sm:$0xff]  ;;  %v712_v31 = vshrl.u32 %v97_v29, 7  ;;  %v592_v9 = vmov 0.0   ;;  %s488_s27 = sshll.u32 %s594_s26, 4  ;;  %s489_s27 = int_to_ptr.vmem [resolvable:$true] %s488_s27 }
   0xd   :  { %v270_v19 = vld [vmem:[%s745_s6] sm:$0xff]  ;;  %v267_v6 = vld [vmem:[%s744_s5 + $0x8] sm:$0xff]  ;;  %v268_v7 = vld [vmem:[%s744_s5 + $0x10] sm:$0xff]  ;;  %546 = vmatprep.subr.mxu0 %v592_v9  ;;  %554 = vmatprep.mubr.msk.f32.mxu0 %vm593_vm2, %v592_v9  ;;  %s568_s28 = scalar_lea.vmem %s489_s27, 16  ;;  %s572_s2 = scalar_lea.vmem %s489_s27, 32 }
   0xe   :  { %89 = vperm.xlu0 %565, %v75_v2   ;;  %v36_v20 = vld [vmem:[%s740_s1] sm:$0xf]  ;;  %v99_v34 = vsub.s32 0, %v712_v31  ;;  %v224_v36 = vsub.s32 1, %v712_v31  ;;  %p569_p0 = scmp.ne.s32.totalorder %s489_s27, %s568_s28  ;;  %p573_p1 = scmp.lt.s32.totalorder %s489_s27, %s489_s27 }
   0xf   :  { %v397_v21 = vld [vmem:[#allocation2] sm:$0x1]  ;;  %p574_p2 = scmp.lt.s32.totalorder %s572_s2, %s568_s28 }
  0x10   :  { %79 = vperm.xlu1 %563, %v73_v11   ;;  %v266_v22 = vld [vmem:[%s744_s5] sm:$0xff] }
  0x11   :  { %540 = vmatprep.mubr.msk.f32.mxu1 %vm294_vm1, %v266_v22  ;;  %p575_p3 = por %p574_p2, %p573_p1 }
  0x12   :  { %255 = vperm.xlu0 %565, %v237_v12  }
  0x13   :  { %p576_p4 = pnand %p575_p3, %p569_p0 }
  0x14   :  { %566 = vset.pattern.permute.xlu1 %v590_v4 }
  0x15   :  { %211 = vperm.xlu1 %566, %v74_v10  }
  0x16   :  { %245 = vperm.xlu0 %565, %v235_v13  }
  0x19   :  { %207 = vperm.xlu1 %566, %v73_v11  }
  0x1d   :  { %567 = vset.pattern.permute.xlu1 %v591_v8  ;;  %v269_v8 = vld [vmem:[%s744_s5 + $0x18] sm:$0xff] }
  0x1e   :  { %250 = vperm.xlu1 %567, %v236_v14  }
  0x22   :  { %240 = vperm.xlu1 %567, %v234_v15  }
  0x26   :  { %291 = vperm.xlu1 %567, %v273_v16  }
  0x2a   :  { %286 = vperm.xlu1 %567, %v272_v17  }
  0x2e   :  { %281 = vperm.xlu1 %567, %v271_v18  }
  0x32   :  { %276 = vperm.xlu1 %567, %v270_v19  }
  0x34   :  { %37 = vxpose.xlu0.b32.start.end [1/1] (short) (narrow) %v36_v20, 8 }
  0x36   :  { %400 = vperm.xlu1 %567, %v397_v21  }
  0x80   :  { %v216_v23 = vpop.permute.xlu0 %215 }
  0x82   :  { %v220_v25 = vpop.permute.xlu1 %219 }
  0x85   :  { %v95_v24 = vpop.permute.xlu0 %94 }
  0x87   :  { %v85_v27 = vpop.permute.xlu1 %84 }
  0x89   :  { %v90_v26 = vpop.permute.xlu0 %89 }
  0x8b   :  { %v80_v30 = vpop.permute.xlu1 %79 }
  0x8d   :  { %v256_v28 = vpop.permute.xlu0 %255 }
  0x90   :  { %v212_v33 = vpop.permute.xlu1 %211 }
  0x91   :  { %v246_v32 = vpop.permute.xlu0 %245 }
  0x94   :  { %v208_v38 = vpop.permute.xlu1 %207 }
  0x99   :  { %v251_v53 = vpop.permute.xlu1 %250 }
  0x9d   :  { %v241_v1 = vpop.permute.xlu1 %240 }
  0xa1   :  { %v292_v10 = vpop.permute.xlu1 %291 }
  0xa5   :  { %v287_v11 = vpop.permute.xlu1 %286 }
  0xa9   :  { %v282_v13 = vpop.permute.xlu1 %281 }
  0xad   :  { %v277_v21 = vpop.permute.xlu1 %276 }
  0xb0   :  { %v53_v35 = vpop.trf.xlu0 }
  0xb1   :  { %v100_v37 = vrot.slane %v53_v35, %v99_v34  ;;  %v225_v40 = vrot.slane %v53_v35, %v224_v36 }
  0xb3   :  { %v102_v41 = vmul.f32 %v100_v37, %v85_v27  ;;  %v227_v43 = vmul.f32 %v225_v40, %v212_v33  ;;  %v101_v45 = vmul.f32 %v100_v37, %v80_v30  ;;  %v104_v46 = vmul.f32 %v100_v37, %v95_v24  ;;  %v401_v27 = vpop.permute.xlu1 %400 }
  0xb4   :  { %v226_v47 = vmul.f32 %v225_v40, %v208_v38  ;;  %v229_v51 = vmul.f32 %v225_v40, %v220_v25  ;;  %v103_v52 = vmul.f32 %v100_v37, %v90_v26  ;;  %v228_v58 = vmul.f32 %v225_v40, %v216_v23  ;;  %v396_v26 = vld [vmem:[%s746_s7] sm:$0x1] }
  0xc8   :  { %v528_v39 = vpop.f32.mrf.mxu0 }
  0xc9   :  { %v193_v44 = vadd.f32 %v528_v39, %v102_v41 }
  0xca   :  { %v187_v42 = vpop.f32.mrf.mxu0 }
  0xcb   :  { %v188_v49 = vadd.f32 %v187_v42, %v101_v45  ;;  %v231_v55 = vadd.f32 %v227_v43, %v193_v44 }
  0xcc   :  { %v531_v48 = vpop.f32.mrf.mxu0 }
  0xcd   :  { %v203_v50 = vadd.f32 %v531_v48, %v104_v46  ;;  %v230_v59 = vadd.f32 %v226_v47, %v188_v49  ;;  %v259_v0 = vadd.f32 %v246_v32, %v231_v55 }
  0xce   :  { %v197_v54 = vpop.f32.mrf.mxu0 }
  0xcf   :  { %v233_v56 = vadd.f32 %v229_v51, %v203_v50  ;;  %v198_v57 = vadd.f32 %v197_v54, %v103_v52  ;;  %v258_v3 = vadd.f32 %v241_v1, %v230_v59  ;;  %v263_v4 = vmax.f32 %v259_v0, 0.0 }
  0xd1   :  { %v232_v60 = vadd.f32 %v228_v58, %v198_v57  ;;  %v261_v61 = vadd.f32 %v256_v28, %v233_v56  ;;  %v262_v5 = vmax.f32 %v258_v3, 0.0  ;;  %v406_v28 = vrot.slane %v401_v27, %v99_v34 }
  0xd3   :  { %v265_v62 = vmax.f32 %v261_v61, 0.0  ;;  %v260_v63 = vadd.f32 %v251_v53, %v232_v60 }
  0xd5   :  { %532 = vmatprep.subr.mxu1 %v265_v62  ;;  %v264_v2 = vmax.f32 %v260_v63, 0.0 }
  0xd6   :  { %533 = vmatpush3.msra.mxu1 %v265_v62 }
  0xd7   :  { %534 = vmatprep.subr.mxu1 %v264_v2 }
  0xd8   :  { %535 = vmatpush3.msra.mxu1 %v264_v2 }
  0xd9   :  { %536 = vmatprep.subr.mxu1 %v263_v4 }
  0xda   :  { %537 = vmatpush3.msra.mxu1 %v263_v4 }
  0xdb   :  { %538 = vmatprep.subr.mxu1 %v262_v5 }
  0xdc   :  { %539 = vmatpush3.msra.mxu1 %v262_v5 }
  0xdd   :  { %541 = vmatmul.mubr.msk.f32.vlgmr.msra.gmra.mxu1 %vm294_vm1, %v267_v6 }
  0xde   :  { %543 = vmatprep.mubr.msk.f32.mxu1 %vm294_vm1, %v268_v7 }
  0xe1   :  { %544 = vmatmul.mubr.msk.f32.gmra.mxu1 %vm294_vm1, %v269_v8 }
 0x19d   :  { %v542_v12 = vpop.f32.mrf.mxu1 }
 0x19e   :  { %v379_v18 = vadd.f32 %v542_v12, %v282_v13 }
 0x19f   :  { %v373_v14 = vpop.f32.mrf.mxu1 }
 0x1a0   :  { %v374_v22 = vadd.f32 %v373_v14, %v277_v21  ;;  %v393_v24 = vmax.f32 %v379_v18, 0.0 }
 0x1a1   :  { %v545_v15 = vpop.f32.mrf.mxu1 }
 0x1a2   :  { %v389_v16 = vadd.f32 %v545_v15, %v292_v10  ;;  %v392_v25 = vmax.f32 %v374_v22, 0.0 }
 0x1a3   :  { %v383_v17 = vpop.f32.mrf.mxu1 }
 0x1a4   :  { %v395_v19 = vmax.f32 %v389_v16, 0.0  ;;  %v384_v20 = vadd.f32 %v383_v17, %v287_v11 }
 0x1a6   :  { %v394_v23 = vmax.f32 %v384_v20, 0.0  ;;  %547 = vmatpush3.msra.mxu0 %v395_v19 }
 0x1a7   :  { %548 = vmatprep.subr.mxu0 %v592_v9 }
 0x1a8   :  { %549 = vmatpush3.msra.mxu0 %v394_v23 }
 0x1a9   :  { %550 = vmatprep.subr.mxu0 %v592_v9 }
 0x1aa   :  { %551 = vmatpush3.msra.mxu0 %v393_v24 }
 0x1ab   :  { %552 = vmatprep.subr.mxu0 %v592_v9 }
 0x1ac   :  { %553 = vmatpush3.msra.mxu0 %v392_v25 }
 0x1ad   :  { %555 = vmatmul.mubr.msk.f32.vlgmr.msra.gmra.mxu0 %vm294_vm1, %v396_v26 }
 0x26d   :  { %v476_v29 = vpop.f32.mrf.mxu0 }
 0x26e   :  { %v477_v30 = vadd.f32 %v476_v29, %v406_v28 }
 0x26f   :  { %v556_v32 = vpop.f32.mrf.mxu0 }
 0x270   :  { %481 = vst.msk [vmem:[#allocation3] sm:$0x1] %vm480_vm3, %v477_v30 }
 0x271   :  { %579 = shalt.err (!%p576_p4)
}
 0x272   :  { %491 = dma.vmem_to_hbm [thread:$0]  %s489_s27, 16, %s748_s9, [#allocation4]  }
 0x273   :  { %588 = dma.done.wait [#allocation4], 16  }
 0x274   :  { %589 = vsyncadd [#allocation4], 4294967280 }
 0x275   :  { %495 = vsyncpa [#allocation4], 1 }

</bundles_post_ra>
